<compile_context>
chip_gen: v7x
topology: tpu7x:2x2x1
jax: 0.10.0
libtpu: 0.0.40
codegen_flags: <defaults>
</compile_context>

<pallas_src>
import jax
import jax.numpy as jnp
from jax import lax
from jax.experimental import pallas as pl
from jax.experimental.pallas import tpu as pltpu

_LANE = 128  # intra-block cumsum width (one MXU pass depth on v5e; fine on v6e/v7x)


def _lovasz_block_kernel(scal_ref, e_ref, g_ref, out_ref):
    b = pl.program_id(0)
    gts = scal_ref[0].astype(jnp.float32)        # total positives (exact integer)
    blk_off = scal_ref[b + 1].astype(jnp.float32)  # positives in all preceding blocks

    e = e_ref[...]                               # (TR, L) f32 sorted errors (descending, flat row-major)
    g_bf = g_ref[...]                            # (TR, L) bf16 0/1 labels in the same permutation
    g = g_bf.astype(jnp.float32)
    TR, L = e.shape

    # --- inclusive cumsum of g over the flat row-major order, two levels ---
    # intra-row: (TR, L) @ (L, L) inclusive-triangular bf16 matmul on the MXU.
    li = lax.broadcasted_iota(jnp.int32, (L, L), 0)
    lj = lax.broadcasted_iota(jnp.int32, (L, L), 1)
    tri_l = (li <= lj).astype(jnp.bfloat16)      # tri_l[j, i] = (j <= i)
    intra = jnp.dot(g_bf, tri_l, preferred_element_type=jnp.float32)        # (TR, L)

    # cross-row: lane-reduce row sums (XLU), then a small strict-triangular
    # matmul (mask built in-kernel; row sums <= 128 so bf16 is exact).
    rs = jnp.sum(g, axis=1, keepdims=True)                                   # (TR, 1)
    rs_b = jnp.broadcast_to(rs, (TR, L)).astype(jnp.bfloat16)                # lanes identical
    ri = lax.broadcasted_iota(jnp.int32, (TR, TR), 0)
    rj = lax.broadcasted_iota(jnp.int32, (TR, TR), 1)
    tri_r = (rj < ri).astype(jnp.bfloat16)                                   # strict lower
    row_off = jnp.dot(tri_r, rs_b, preferred_element_type=jnp.float32)       # (TR, L), lanes identical

    csum = intra + row_off + blk_off             # global inclusive cumsum of labels
    cex = csum - g                               # global exclusive cumsum

    # --- Lovasz gradient, first difference computed directly ---
    # grad[i] = (gts - cex)/(gts + i - cex) - (gts - csum)/(gts + i + 1 - csum)
    # with the first term replaced by 1 at i == 0 (so grad[0] = jaccard[0]).
    r_idx = lax.broadcasted_iota(jnp.int32, (TR, L), 0)
    l_idx = lax.broadcasted_iota(jnp.int32, (TR, L), 1)
    idx = b * (TR * L) + r_idx * L + l_idx       # global flat index, int32 (exact)
    idx_f = idx.astype(jnp.float32)

    denom_prev = jnp.maximum(gts + idx_f - cex, 1.0)   # >= 1 for i >= 1; clamp only guards i == 0
    term_prev = jnp.where(idx == 0, 1.0, (gts - cex) / denom_prev)
    term_cur = (gts - csum) / (gts + idx_f + 1.0 - csum)
    grad = term_prev - term_cur

    blk_loss = jnp.sum(jnp.maximum(e, 0.0) * grad)
    out_ref[...] = blk_loss + jnp.zeros((1, 8, L), jnp.float32)


def lovasz_hinge_loss(inputs, targets, *, rows_per_block=512):
    """Forward of LovaszHingeLoss (per_image=False, ignore=None)."""
    logits = inputs.reshape(-1).astype(jnp.float32)
    labels = targets.reshape(-1).astype(jnp.float32)
    P = logits.shape[0]
    if P == 0:
        return jnp.zeros((), jnp.float32)
    L = _LANE

    # errors = 1 - logits * signs (plain JAX; XLA fuses it into the sort input).
    errors = 1.0 - logits * (2.0 * labels - 1.0)

    # Descending keyed sort; labels travel as payload (no argsort + gathers).
    # TODO(synk): torch.sort has no clean in-kernel Pallas/Mosaic equivalent;
    # the keyed sort stays in plain JAX before the kernel.
    neg_sorted, gt_sorted = lax.sort((-errors, labels), num_keys=1)
    errors_sorted = -neg_sorted

    # Rows per grid block: multiple of 8, capped so the per-step VMEM footprint
    # stays at a few MiB on every generation (incl. v7x's 64 MiB VMEM).
    r_needed = -(-P // L)
    tr = min(rows_per_block, ((r_needed + 7) // 8) * 8)
    tr = max(8, (tr // 8) * 8)
    blk = tr * L
    num_blocks = -(-P // blk)
    P_pad = num_blocks * blk
    pad = P_pad - P
    # Pads are appended AFTER the sort (last in flat order) with error=-1
    # (relu -> 0) and label=0, so they perturb neither the cumsum nor the dot.
    if pad:
        errors_sorted = jnp.concatenate(
            [errors_sorted, jnp.full((pad,), -1.0, jnp.float32)])
        gt_sorted = jnp.concatenate(
            [gt_sorted, jnp.zeros((pad,), jnp.float32)])
    R = P_pad // L

    e2 = errors_sorted.reshape(R, L)                      # f32 errors
    g2 = gt_sorted.reshape(R, L).astype(jnp.bfloat16)     # bf16 labels (0/1 -> exact)

    # Wrapper-side scalars: total positives and per-block exclusive prefix of
    # positives, packed into one int32 SMEM prefetch array [gts, off_0, ...].
    # TODO(synk): beyond ~2^24 positives the f32 jaccard denominators drift;
    # that limit is inherent to the f32 math of the reference.
    blk_sums = gt_sorted.reshape(num_blocks, blk).astype(jnp.int32).sum(axis=1)
    gts = blk_sums.sum()
    blk_off = jnp.cumsum(blk_sums) - blk_sums
    scal = jnp.concatenate([gts[None], blk_off]).astype(jnp.int32)   # (num_blocks + 1,)

    grid_spec = pltpu.PrefetchScalarGridSpec(
        num_scalar_prefetch=1,
        grid=(num_blocks,),
        in_specs=[pl.BlockSpec((tr, L), lambda b, s: (b, 0)),
                  pl.BlockSpec((tr, L), lambda b, s: (b, 0))],
        out_specs=pl.BlockSpec((1, 8, L), lambda b, s: (b, 0, 0)),
    )
    partial = pl.pallas_call(
        _lovasz_block_kernel,
        out_shape=jax.ShapeDtypeStruct((num_blocks, 8, L), jnp.float32),
        grid_spec=grid_spec,
        compiler_params=pltpu.CompilerParams(
            dimension_semantics=("parallel",)),
    )(scal, e2, g2)
    return jnp.sum(partial[:, 0, 0])


def _reference(inputs, targets):
    """Pure-JAX mirror of the PyTorch code, for verification."""
    logits = inputs.reshape(-1).astype(jnp.float32)
    labels = targets.reshape(-1).astype(jnp.float32)
    signs = 2.0 * labels - 1.0
    errors = 1.0 - logits * signs
    order = jnp.argsort(-errors)
    errors_sorted = errors[order]
    gt_sorted = labels[order]
    gts = gt_sorted.sum()
    intersection = gts - jnp.cumsum(gt_sorted)
    union = gts + jnp.cumsum(1.0 - gt_sorted)
    jaccard = 1.0 - intersection / union
    grad = jnp.concatenate([jaccard[:1], jaccard[1:] - jaccard[:-1]])
    return jnp.sum(jnp.maximum(errors_sorted, 0.0) * grad)


if __name__ == "__main__":
    key = jax.random.PRNGKey(0)
    k1, k2, k3, k4 = jax.random.split(key, 4)

    # Small default shape (B, H, W) = (2, 16, 16) -> P = 512, single grid block.
    B, H, W = 2, 16, 16
    logits = jax.random.normal(k1, (B, H, W), dtype=jnp.float32)
    targets = (jax.random.uniform(k2, (B, H, W)) > 0.5).astype(jnp.float32)
    loss = jax.block_until_ready(lovasz_hinge_loss(logits, targets))
    ref = jax.block_until_ready(_reference(logits, targets))
    assert jnp.allclose(loss, ref, rtol=1e-4, atol=1e-4), (loss, ref)

    # Slightly larger case with a small block cap to exercise the multi-block
    # grid path (scalar-prefetched offsets + per-block partial losses).
    B2, H2, W2 = 2, 32, 32                       # P = 2048 -> 16 rows -> 2 blocks at tr = 8
    logits2 = jax.random.normal(k3, (B2, H2, W2), dtype=jnp.float32)
    targets2 = (jax.random.uniform(k4, (B2, H2, W2)) > 0.5).astype(jnp.float32)
    loss2 = jax.block_until_ready(
        lovasz_hinge_loss(logits2, targets2, rows_per_block=8))
    ref2 = jax.block_until_ready(_reference(logits2, targets2))
    assert jnp.allclose(loss2, ref2, rtol=1e-4, atol=1e-4), (loss2, ref2)

    print("KERNEL_OK")
</pallas_src>

<mosaic_0001>
module attributes {stable_mosaic.version = 11 : i64} {
  func.func @_lovasz_block_kernel(%arg0: i32, %arg1: memref<2xi32, #tpu.memory_space<smem>>, %arg2: memref<8x128xf32, #tpu.memory_space<vmem>>, %arg3: memref<8x128xbf16, #tpu.memory_space<vmem>>, %arg4: memref<1x8x128xf32, #tpu.memory_space<vmem>>) attributes {dimension_semantics = [#tpu.dimension_semantics<parallel>], iteration_bounds = array<i64: 1>, scalar_prefetch = 1 : i64, scratch_operands = 0 : i64, tpu.core_type = #tpu.core_type<tc>, window_params = [{transform_indices = @transform_0, window_bounds = array<i64: 8, 128>}, {transform_indices = @transform_1, window_bounds = array<i64: 8, 128>}, {transform_indices = @transform_2, window_bounds = array<i64: 1, 8, 128>}]} {
    %c0 = arith.constant 0 : index
    %0 = memref.load %arg1[%c0] : memref<2xi32, #tpu.memory_space<smem>>
    %1 = arith.sitofp %0 : i32 to f32
    %c1_i32 = arith.constant 1 : i32
    %2 = arith.addi %arg0, %c1_i32 : i32
    %3 = arith.index_cast %2 : i32 to index
    %4 = memref.load %arg1[%3] : memref<2xi32, #tpu.memory_space<smem>>
    %5 = arith.sitofp %4 : i32 to f32
    %c0_0 = arith.constant 0 : index
    %c0_1 = arith.constant 0 : index
    %6 = vector.load %arg2[%c0_0, %c0_1] : memref<8x128xf32, #tpu.memory_space<vmem>>, vector<8x128xf32>
    %c0_2 = arith.constant 0 : index
    %c0_3 = arith.constant 0 : index
    %7 = vector.load %arg3[%c0_2, %c0_3] : memref<8x128xbf16, #tpu.memory_space<vmem>>, vector<8x128xbf16>
    %8 = arith.extf %7 : vector<8x128xbf16> to vector<8x128xf32>
    %9 = tpu.iota {dimensions = array<i32: 0>} : vector<128x128xi32>
    %10 = tpu.iota {dimensions = array<i32: 1>} : vector<128x128xi32>
    %11 = arith.cmpi sle, %9, %10 : vector<128x128xi32>
    %12 = arith.extui %11 : vector<128x128xi1> to vector<128x128xi32>
    %13 = arith.sitofp %12 : vector<128x128xi32> to vector<128x128xf32>
    %14 = arith.truncf %13 : vector<128x128xf32> to vector<128x128xbf16>
    %cst = arith.constant dense<0.000000e+00> : vector<8x128xf32>
    %15 = tpu.matmul %7, %14, %cst {dimension_numbers = #tpu.dot_dimension_numbers<[1], [0], [0], [1], [0, 0, 1, 1], [], []>} : vector<8x128xbf16>, vector<128x128xbf16>, vector<8x128xf32> -> vector<8x128xf32>
    %cst_4 = arith.constant dense<0.000000e+00> : vector<8xf32>
    %16 = vector.multi_reduction <add>, %8, %cst_4 [1] : vector<8x128xf32> to vector<8xf32>
    %17 = vector.shape_cast %16 : vector<8xf32> to vector<8x1xf32>
    %18 = vector.shape_cast %17 : vector<8x1xf32> to vector<8x1xf32>
    %19 = vector.broadcast %18 : vector<8x1xf32> to vector<8x128xf32>
    %20 = arith.truncf %19 : vector<8x128xf32> to vector<8x128xbf16>
    %21 = tpu.iota {dimensions = array<i32: 0>} : vector<8x8xi32>
    %22 = tpu.iota {dimensions = array<i32: 1>} : vector<8x8xi32>
    %23 = arith.cmpi slt, %22, %21 : vector<8x8xi32>
    %24 = arith.extui %23 : vector<8x8xi1> to vector<8x8xi32>
    %25 = arith.sitofp %24 : vector<8x8xi32> to vector<8x8xf32>
    %26 = arith.truncf %25 : vector<8x8xf32> to vector<8x8xbf16>
    %cst_5 = arith.constant dense<0.000000e+00> : vector<8x128xf32>
    %27 = tpu.matmul %26, %20, %cst_5 {dimension_numbers = #tpu.dot_dimension_numbers<[1], [0], [0], [1], [0, 0, 1, 1], [], []>} : vector<8x8xbf16>, vector<8x128xbf16>, vector<8x128xf32> -> vector<8x128xf32>
    %28 = arith.addf %15, %27 : vector<8x128xf32>
    %29 = vector.broadcast %5 : f32 to vector<8x128xf32>
    %30 = arith.addf %28, %29 : vector<8x128xf32>
    %31 = arith.subf %30, %8 : vector<8x128xf32>
    %32 = tpu.iota {dimensions = array<i32: 0>} : vector<8x128xi32>
    %33 = tpu.iota {dimensions = array<i32: 1>} : vector<8x128xi32>
    %c1024_i32 = arith.constant 1024 : i32
    %34 = arith.muli %arg0, %c1024_i32 : i32
    %c128_i32 = arith.constant 128 : i32
    %35 = vector.broadcast %c128_i32 : i32 to vector<8x128xi32>
    %36 = arith.muli %32, %35 : vector<8x128xi32>
    %37 = vector.broadcast %34 : i32 to vector<8x128xi32>
    %38 = arith.addi %37, %36 : vector<8x128xi32>
    %39 = arith.addi %38, %33 : vector<8x128xi32>
    %40 = arith.sitofp %39 : vector<8x128xi32> to vector<8x128xf32>
    %41 = vector.broadcast %1 : f32 to vector<8x128xf32>
    %42 = arith.addf %41, %40 : vector<8x128xf32>
    %43 = arith.subf %42, %31 : vector<8x128xf32>
    %cst_6 = arith.constant 1.000000e+00 : f32
    %44 = vector.broadcast %cst_6 : f32 to vector<8x128xf32>
    %45 = arith.maximumf %43, %44 : vector<8x128xf32>
    %c0_i32 = arith.constant 0 : i32
    %46 = vector.broadcast %c0_i32 : i32 to vector<8x128xi32>
    %47 = arith.cmpi eq, %39, %46 : vector<8x128xi32>
    %48 = vector.broadcast %1 : f32 to vector<8x128xf32>
    %49 = arith.subf %48, %31 : vector<8x128xf32>
    %50 = arith.divf %49, %45 : vector<8x128xf32>
    %cst_7 = arith.constant 1.000000e+00 : f32
    %51 = vector.broadcast %cst_7 : f32 to vector<8x128xf32>
    %52 = arith.select %47, %51, %50 : vector<8x128xi1>, vector<8x128xf32>
    %53 = vector.broadcast %1 : f32 to vector<8x128xf32>
    %54 = arith.subf %53, %30 : vector<8x128xf32>
    %55 = vector.broadcast %1 : f32 to vector<8x128xf32>
    %56 = arith.addf %55, %40 : vector<8x128xf32>
    %cst_8 = arith.constant 1.000000e+00 : f32
    %57 = vector.broadcast %cst_8 : f32 to vector<8x128xf32>
    %58 = arith.addf %56, %57 : vector<8x128xf32>
    %59 = arith.subf %58, %30 : vector<8x128xf32>
    %60 = arith.divf %54, %59 : vector<8x128xf32>
    %61 = arith.subf %52, %60 : vector<8x128xf32>
    %cst_9 = arith.constant 0.000000e+00 : f32
    %62 = vector.broadcast %cst_9 : f32 to vector<8x128xf32>
    %63 = arith.maximumf %6, %62 : vector<8x128xf32>
    %64 = arith.mulf %63, %61 : vector<8x128xf32>
    %65 = vector.shape_cast %64 : vector<8x128xf32> to vector<1x8x128xf32>
    %cst_10 = arith.constant dense<0.000000e+00> : vector<1xf32>
    %66 = vector.multi_reduction <add>, %65, %cst_10 [1, 2] : vector<1x8x128xf32> to vector<1xf32>
    %67 = vector.shape_cast %66 : vector<1xf32> to vector<1x1x1xf32>
    %68 = vector.extract %67[0, 0, 0] : f32 from vector<1x1x1xf32>
    %cst_11 = arith.constant 0.000000e+00 : f32
    %69 = vector.broadcast %cst_11 : f32 to vector<1x8x128xf32>
    %70 = vector.broadcast %68 : f32 to vector<1x8x128xf32>
    %71 = arith.addf %70, %69 : vector<1x8x128xf32>
    %c0_12 = arith.constant 0 : index
    %c0_13 = arith.constant 0 : index
    %c0_14 = arith.constant 0 : index
    %72 = vector.load %arg4[%c0_12, %c0_13, %c0_14] : memref<1x8x128xf32, #tpu.memory_space<vmem>>, vector<1x8x128xf32>
    tpu.vector_store %arg4[%c0_12, %c0_13, %c0_14], %71 {strides = array<i32>} : memref<1x8x128xf32, #tpu.memory_space<vmem>>, vector<1x8x128xf32>,
    return
  }
  func.func @transform_0(%arg0: i32, %arg1: memref<2xi32, #tpu.memory_space<smem>>) -> (i32, i32) {
    %c0_i32 = arith.constant 0 : i32
    %c0_i32_0 = arith.constant 0 : i32
    return %arg0, %c0_i32 : i32, i32
  }
  func.func @transform_1(%arg0: i32, %arg1: memref<2xi32, #tpu.memory_space<smem>>) -> (i32, i32) {
    %c0_i32 = arith.constant 0 : i32
    %c0_i32_0 = arith.constant 0 : i32
    return %arg0, %c0_i32 : i32, i32
  }
  func.func @transform_2(%arg0: i32, %arg1: memref<2xi32, #tpu.memory_space<smem>>) -> (i32, i32, i32) {
    %c0_i32 = arith.constant 0 : i32
    %c0_i32_0 = arith.constant 0 : i32
    %c0_i32_1 = arith.constant 0 : i32
    return %arg0, %c0_i32, %c0_i32_0 : i32, i32, i32
  }
}

</mosaic_0001>

<bundles_post_ra>
// kernel: tpu_custom_call.1
= control target key start
LH: loop header
LB: loop body
LE: loop exit
PB: predicated region body
PF: predicated region fallthrough
CT: control target
= control target key end

     0   :  { %s530_s0 = inlined_call_operand.hbm [shape: s32[2], index: 0, kind: input, shape index: {}]   ;;  %s531_s1 = inlined_call_operand.hbm [shape: f32[8,128], index: 1, kind: input, shape index: {}]   ;;  %s532_s2 = inlined_call_operand.vmem [shape: bf16[8,128], index: 2, kind: input, shape index: {}]   ;;  %s533_s3 = inlined_call_operand.hbm [shape: f32[1,8,128], index: 3, kind: output, shape index: {}]  }
   0x1   :  { %s345_s14 = scalar_lea.hbm %s530_s0, 16 }
   0x2   :  { %p346_p0 = scmp.ne.s32.totalorder %s530_s0, %s345_s14  ;;  %p349_p1 = scmp.lt.u32.totalorder %s345_s14, %s530_s0 }
   0x4   :  { %p351_p2 = pnand %p349_p1, %p346_p0 }
   0x6   :  { %354 = shalt.err (!%p351_p2)  }
   0x7   :  { %s405_s19 = smov [#allocation3]  }
   0x8   :  { %9 = dma.hbm_to_smem %s530_s0, 16, %s405_s19, [#allocation2] }
   0x9   :  { %399 = dma.done.wait [#allocation2], 16 }
   0xa   :  { %400 = vsyncadd [#allocation2], 4294967280 }
   0xb   :  { %11 = sfence }
   0xc   :  { %12 = vsyncpa [#allocation5], 0 }
   0xd   :  { %13 = vsyncpa [#allocation6], 0  ;;  %s406_s22 = smov [#allocation4]   ;;  %s355_s26 = scalar_lea.hbm %s531_s1, 128 }
   0xe   :  { %s20_s23 = sshll.u32 %s406_s22, 4  ;;  %p356_p3 = scmp.ne.s32.totalorder %s531_s1, %s355_s26  ;;  %s21_s23 = int_to_ptr.vmem [resolvable:$true] %s20_s23 }
   0xf   :  { %p359_p4 = scmp.lt.u32.totalorder %s355_s26, %s531_s1 }
  0x11   :  { %p361_p5 = pnand %p359_p4, %p356_p3 }
  0x13   :  { %364 = shalt.err (!%p361_p5)
}
  0x14   :  { %s365_s0 = scalar_lea.vmem %s21_s23, 128  ;;  %p370_p7 = scmp.lt.s32.totalorder %s21_s23, %s21_s23 }
  0x15   :  { %p366_p6 = scmp.ne.s32.totalorder %s21_s23, %s365_s0  ;;  %p371_p8 = scmp.lt.s32.totalorder %s365_s0, %s365_s0 }
  0x17   :  { %p372_p9 = por %p371_p8, %p370_p7 }
  0x19   :  { %p373_p10 = pnand %p372_p9, %p366_p6 }
  0x1b   :  { %376 = shalt.err (!%p373_p10)
}
  0x1c   :  { %23 = dma.hbm_to_vmem [thread:$0]  %s531_s1, 128, %s21_s23, [#allocation5]  }
  0x1d   :  { %401 = dma.done.wait [#allocation5], 128  }
  0x1e   :  { %402 = vsyncadd [#allocation5], 4294967168  ;;  %v38_v0 = vlaneseq  ;;  %v407_v1 = vmov 0.0   ;;  %v474_v9 = vld [vmem:[%s532_s2] sm:$0xf]  ;;  %s30_s2 = sld [smem:[#allocation3]] }
  0x1f   :  { %313 = vmatprep.subr.bf16.mxu1 %v407_v1  ;;  %307 = vmatprep.subr.bf16.mxu0 %v407_v1  ;;  %v37_v10 = vunpack.c.l.bf16 %v474_v9  ;;  %v408_v11 = vmov 1.0|1.0   ;;  %s261_s7 = sld [smem:[#allocation3 + $0x1]]  ;;  %v35_v49 = vld [vmem:[#allocation4] sm:$0xff]  ;;  %s410_s10 = smov [#allocation7]  }
  0x20   :  { %v457_v2 = vshrl.u32 %v38_v0, 7  ;;  %v459_v3 = vand.u32 127, %v38_v0  ;;  %v232_v55 = vmax.f32 %v35_v49, 0.0  ;;  %s252_s11 = sshll.u32 %s410_s10, 4  ;;  %s253_s11 = int_to_ptr.vmem [resolvable:$true] %s252_s11 }
  0x21   :  { %113 = vadd.xlane.f32.xlu0 %v37_v10  ;;  %s377_s13 = scalar_lea.vmem %s253_s11, 128  ;;  %p382_p12 = scmp.lt.s32.totalorder %s253_s11, %s253_s11 }
  0x22   :  { %v40_v4 = vadd.s32 8, %v457_v2  ;;  %vm57_vm0 = vcmp.le.s32.totalorder %v457_v2, %v459_v3  ;;  %v41_v5 = vadd.s32 16, %v457_v2  ;;  %v42_v6 = vadd.s32 24, %v457_v2  ;;  %p378_p11 = scmp.ne.s32.totalorder %s253_s11, %s377_s13  ;;  %p383_p13 = scmp.lt.s32.totalorder %s377_s13, %s377_s13 }
  0x23   :  { %v43_v7 = vadd.s32 32, %v457_v2  ;;  %v44_v8 = vadd.s32 40, %v457_v2  ;;  %v45_v12 = vadd.s32 48, %v457_v2  ;;  %v46_v13 = vadd.s32 56, %v457_v2 }
  0x24   :  { %vm58_vm1 = vcmp.le.s32.totalorder %v40_v4, %v459_v3  ;;  %vm59_vm2 = vcmp.le.s32.totalorder %v41_v5, %v459_v3  ;;  %vm60_vm3 = vcmp.le.s32.totalorder %v42_v6, %v459_v3  ;;  %v47_v14 = vadd.s32 64, %v457_v2  ;;  %s31_s8 = scvt.s32.f32 %s30_s2  ;;  %p384_p0 = por %p383_p13, %p382_p12 }
  0x25   :  { %vm280_vm4 = vmpackc.low %vm58_vm1, %vm57_vm0  ;;  %vm61_vm6 = vcmp.le.s32.totalorder %v43_v7, %v459_v3  ;;  %vm62_vm7 = vcmp.le.s32.totalorder %v44_v8, %v459_v3  ;;  %vm63_vm9 = vcmp.le.s32.totalorder %v45_v12, %v459_v3  ;;  %vm64_vm10 = vcmp.le.s32.totalorder %v46_v13, %v459_v3  ;;  %s34_s9 = scvt.s32.f32 %s261_s7 }
  0x26   :  { %314 = vmatpush3.bf16.msk.msra.mxu1 %vm280_vm4, %v408_v11  ;;  %vm282_vm5 = vmpackc.low %vm60_vm3, %vm59_vm2  ;;  %v48_v15 = vadd.s32 72, %v457_v2  ;;  %vm65_vm12 = vcmp.le.s32.totalorder %v47_v14, %v459_v3  ;;  %v49_v16 = vadd.s32 80, %v457_v2  ;;  %v50_v17 = vadd.s32 88, %v457_v2  ;;  %p385_p1 = pnand %p384_p0, %p378_p11 }
  0x27   :  { %315 = vmatprep.subr.bf16.mxu1 %v407_v1  ;;  %vm284_vm8 = vmpackc.low %vm62_vm7, %vm61_vm6  ;;  %v51_v18 = vadd.s32 96, %v457_v2  ;;  %v52_v19 = vadd.s32 104, %v457_v2  ;;  %vm409_vm2 = vmmov 0   ;;  %v53_v20 = vadd.s32 112, %v457_v2 }
  0x28   :  { %vm286_vm11 = vmpackc.low %vm64_vm10, %vm63_vm9  ;;  %vm66_vm13 = vcmp.le.s32.totalorder %v48_v15, %v459_v3  ;;  %vm67_vm15 = vcmp.le.s32.totalorder %v49_v16, %v459_v3  ;;  %vm68_vm0 = vcmp.le.s32.totalorder %v50_v17, %v459_v3  ;;  %329 = vmatprep.mubr.msk.bf16.mxu1 %vm409_vm2, %v407_v1  ;;  %v54_v21 = vadd.s32 120, %v457_v2  ;;  %309 = vmatprep.mubr.msk.bf16.mxu0 %vm409_vm2, %v407_v1 }
  0x29   :  { %vm288_vm14 = vmpackc.low %vm66_vm13, %vm65_vm12  ;;  %vm69_vm3 = vcmp.le.s32.totalorder %v51_v18, %v459_v3  ;;  %vm70_vm4 = vcmp.le.s32.totalorder %v52_v19, %v459_v3  ;;  %vm71_vm6 = vcmp.le.s32.totalorder %v53_v20, %v459_v3  ;;  %vm116_vm9 = vcmp.lt.s32.totalorder %v459_v3, %v457_v2 }
  0x2a   :  { %316 = vmatpush3.bf16.msk.msra.mxu1 %vm282_vm5, %v408_v11  ;;  %vm290_vm1 = vmpackc.low %vm68_vm0, %vm67_vm15  ;;  %vm72_vm7 = vcmp.le.s32.totalorder %v54_v21, %v459_v3  ;;  %vm124_vm10 = vcmask 1043456   ;;  %v278_v23 = vsel %vm116_vm9, 1.0, %v407_v1  ;;  %v212_v31 = vmul.u32 128, %v457_v2 }
  0x2b   :  { %317 = vmatprep.subr.bf16.mxu1 %v407_v1  ;;  %vm292_vm5 = vmpackc.low %vm70_vm4, %vm69_vm3  ;;  %v119_v26 = vpack.c.bf16 %v278_v23, %v278_v23  ;;  %v217_v34 = vstv %s31_s8  ;;  %v208_v37 = vstv %s34_s9 }
  0x2c   :  { %v215_v32 = vadd.s32 %v212_v31, %v459_v3 }
  0x2e   :  { %318 = vmatpush3.bf16.msk.msra.mxu1 %vm284_vm8, %v408_v11  ;;  %vm294_vm8 = vmpackc.low %vm72_vm7, %vm71_vm6  ;;  %v216_v33 = vcvt.s32.f32 %v215_v32  ;;  %vm221_vm12 = vcmp.eq.s32.totalorder %v215_v32, 0 }
  0x2f   :  { %319 = vmatprep.subr.bf16.mxu1 %v407_v1 }
  0x30   :  { %v218_v35 = vadd.f32 %v217_v34, %v216_v33 }
  0x32   :  { %320 = vmatpush3.bf16.msk.msra.mxu1 %vm286_vm11, %v408_v11  ;;  %vm120_vm11 = vcmask 64512   ;;  %v227_v40 = vadd.f32 1.0, %v218_v35 }
  0x33   :  { %321 = vmatprep.subr.bf16.mxu1 %v407_v1 }
  0x36   :  { %322 = vmatpush3.bf16.msk.msra.mxu1 %vm288_vm14, %v408_v11 }
  0x37   :  { %323 = vmatprep.subr.bf16.mxu1 %v407_v1 }
  0x3a   :  { %324 = vmatpush3.bf16.msk.msra.mxu1 %vm290_vm1, %v408_v11 }
  0x3b   :  { %325 = vmatprep.subr.bf16.mxu1 %v407_v1 }
  0x3e   :  { %326 = vmatpush3.bf16.msk.msra.mxu1 %vm292_vm5, %v408_v11 }
  0x3f   :  { %327 = vmatprep.subr.bf16.mxu1 %v407_v1 }
  0x42   :  { %328 = vmatpush3.bf16.msk.msra.mxu1 %vm294_vm8, %v408_v11 }
  0x45   :  { %330 = vmatmul.mubr.bf16.vlgmr.msra.gmra.mrb[0].mxu1 %v474_v9 }
  0xae   :  { %v114_v22 = vpop.xlane.xlu0 %113 }
  0xaf   :  { %v115_v24 = vpack.c.bf16 %v114_v22, %v114_v22 }
  0xb1   :  { %v126_v25 = vsel %vm124_vm10, %v115_v24, 0 }
  0xb2   :  { %308 = vmatpush3.bf16.msra.mxu0 %v126_v25 }
  0xb5   :  { %310 = vmatmul.mubr.msk.bf16.vlgmr.msra.gmra.mrb[0].mxu0 %vm120_vm11, %v119_v26 }
 0x118   :  { %v202_v27 = vpop.f32.mrb[0].mxu1 }
 0x119   :  { %v331_v28 = vpop.f32.mrb[1].mxu1 }
 0x11a   :  { %v205_v29 = vpop.f32.mrb[2].mxu1 }
 0x11b   :  { %v332_v30 = vpop.f32.mrb[3].mxu1 }
 0x188   :  { %v162_v36 = vpop.f32.mrb[0].mxu0 }
 0x189   :  { %v203_v38 = vadd.f32 %v202_v27, %v162_v36  ;;  %v311_v39 = vpop.f32.mrb[1].mxu0 }
 0x18a   :  { %v165_v41 = vpop.f32.mrb[2].mxu0 }
 0x18b   :  { %v209_v42 = vadd.f32 %v208_v37, %v203_v38  ;;  %v312_v43 = vpop.f32.mrb[3].mxu0 }
 0x18d   :  { %v210_v44 = vsub.f32 %v209_v42, %v37_v10  ;;  %v228_v45 = vsub.f32 %v227_v40, %v209_v42  ;;  %v226_v52 = vsub.f32 %v217_v34, %v209_v42 }
 0x18f   :  { %v219_v46 = vsub.f32 %v218_v35, %v210_v44  ;;  %341 = vrcp.f32 %v228_v45  ;;  %v222_v50 = vsub.f32 %v217_v34, %v210_v44 }
 0x191   :  { %v220_v47 = vmax.f32 %v219_v46, 1.0 }
 0x193   :  { %343 = vrcp.f32 %v220_v47 }
 0x199   :  { %v342_v48 = vpop.eup %341 }
 0x19a   :  { %v230_v54 = vmul.f32 %v342_v48, %v226_v52 }
 0x19d   :  { %v344_v51 = vpop.eup %343 }
 0x19e   :  { %v224_v53 = vmul.f32 %v344_v51, %v222_v50 }
 0x1a0   :  { %v225_v56 = vsel %vm221_vm12, 1.0, %v224_v53 }
 0x1a1   :  { %v231_v57 = vsub.f32 %v225_v56, %v230_v54 }
 0x1a3   :  { %v233_v58 = vmul.f32 %v232_v55, %v231_v57 }
 0x1a5   :  { %234 = vadd.xlane.f32.xlu0 %v233_v58 }
 0x232   :  { %v235_v59 = vpop.xlane.xlu0 %234 }
 0x233   :  { %v236_v60 = vrot.slane %v235_v59, 4 }
 0x235   :  { %v237_v61 = vadd.f32 %v236_v60, %v235_v59 }
 0x237   :  { %v238_v62 = vrot.slane %v237_v61, 2 }
 0x239   :  { %v239_v63 = vadd.f32 %v238_v62, %v237_v61 }
 0x23b   :  { %v240_v0 = vrot.slane %v239_v63, 1 }
 0x23d   :  { %v241_v1 = vadd.f32 %v240_v0, %v239_v63 }
 0x23f   :  { %333 = vpush %v241_v1 }
 0x270   :  { %s334_s12 = spop %333 }
 0x271   :  { %v243_v2 = vstv %s334_s12 }
 0x272   :  { %245 = vst [vmem:[#allocation7] sm:$0xff] %v243_v2 }
 0x273   :  { %388 = shalt.err (!%p385_p1)
}
 0x274   :  { %s389_s16 = scalar_lea.hbm %s533_s3, 128 }
 0x275   :  { %p390_p2 = scmp.ne.s32.totalorder %s533_s3, %s389_s16  ;;  %p393_p3 = scmp.lt.u32.totalorder %s389_s16, %s533_s3 }
 0x277   :  { %p395_p4 = pnand %p393_p3, %p390_p2 }
 0x279   :  { %398 = shalt.err (!%p395_p4)
}
 0x27a   :  { %255 = dma.vmem_to_hbm [thread:$0]  %s253_s11, 128, %s533_s3, [#allocation6]  }
 0x27b   :  { %403 = dma.done.wait [#allocation6], 128  }
 0x27c   :  { %404 = vsyncadd [#allocation6], 4294967168 }
 0x27d   :  { %259 = vsyncpa [#allocation5], 1 }
 0x27e   :  { %260 = vsyncpa [#allocation6], 1 }

</bundles_post_ra>
